<compile_context>
chip_gen: v7x
topology: tpu7x:2x2x1
jax: 0.10.0
libtpu: 0.0.40
codegen_flags: <defaults>
</compile_context>

<pallas_src>
import jax
import jax.numpy as jnp
from jax.experimental import pallas as pl
from jax.experimental.pallas import tpu as pltpu

_MIB = 1024 * 1024


def _round_up(x, m):
    return ((x + m - 1) // m) * m


def _vmem_capacity_bytes():
    try:
        info = pltpu.get_tpu_info()
        cap = getattr(info, "vmem_capacity_bytes", None)
        if cap:
            return int(cap)
    except Exception:
        pass
    return 64 * _MIB  # conservative default (v7x per-TensorCore)


def _default_vmem_limit(cap):
    if cap >= 128 * _MIB:
        return 100 * _MIB                     # v5e / v6e
    return max(min(cap - 12 * _MIB, int(cap * 0.85)), 32 * _MIB)   # v7x-class


# ----------------------------------------------------------------------------
# Kernels
# ----------------------------------------------------------------------------
def _ffn_resident_kernel(x_ref, w1_ref, b1_ref, w2_ref, b2_ref, o_ref):
    # x_ref : (tile_m, E_pad) bf16       w1_ref: (E_pad, H_pad) bf16 (VMEM-resident)
    # b1_ref: (1, H_pad)     f32         w2_ref: (H_pad, E_pad) bf16 (VMEM-resident)
    # b2_ref: (1, E_pad)     f32         o_ref : (tile_m, E_pad) out dtype
    h = jnp.dot(x_ref[...], w1_ref[...], preferred_element_type=jnp.float32)
    h = jnp.maximum(h + b1_ref[...], 0.0)               # bias + ReLU in f32 (VPU)
    y = jnp.dot(h.astype(w2_ref.dtype), w2_ref[...],
                preferred_element_type=jnp.float32)
    o_ref[...] = (y + b2_ref[...]).astype(o_ref.dtype)


def _ffn_streamed_kernel(x_ref, w1_ref, b1_ref, w2_ref, b2_ref, o_ref, *acc):
    # x_ref : (tile_m, E_pad) bf16        w1_ref: (1, E_pad, tile_h) bf16 (contiguous block)
    # b1_ref: (1, tile_h)     f32         w2_ref: (tile_h, E_pad)    bf16
    # b2_ref: (1, E_pad)      f32         o_ref : (tile_m, E_pad)
    # acc   : optional (tile_m, E_pad) f32 scratch, only when o_ref is not f32.
    acc_ref = acc[0] if acc else o_ref
    h_idx = pl.program_id(1)

    @pl.when(h_idx == 0)
    def _init():
        # b2 is added exactly once by seeding the accumulator with it.
        acc_ref[...] = jnp.broadcast_to(b2_ref[...], acc_ref.shape)

    h = jnp.dot(x_ref[...], w1_ref[0], preferred_element_type=jnp.float32)
    h = jnp.maximum(h + b1_ref[...], 0.0)
    acc_ref[...] += jnp.dot(h.astype(w2_ref.dtype), w2_ref[...],
                            preferred_element_type=jnp.float32)

    if acc:  # only when output dtype != f32
        @pl.when(h_idx == pl.num_programs(1) - 1)
        def _finalize():
            o_ref[...] = acc_ref[...].astype(o_ref.dtype)


# ----------------------------------------------------------------------------
# Factory: prepare (pad / cast / lay out) the weights once, return f(x).
# ----------------------------------------------------------------------------
def make_feed_forward(w1t, b1, w2t, b2, *, tile_m=None, tile_h=None,
                      out_dtype=None, force_streamed=False,
                      vmem_limit_bytes=None):
    """w1t: (E, H) = W1.T ; b1: (H,) ; w2t: (H, E) = W2.T ; b2: (E,)."""
    w1t = jnp.asarray(w1t)
    b1 = jnp.asarray(b1)
    w2t = jnp.asarray(w2t)
    b2 = jnp.asarray(b2)
    E, H = w1t.shape
    assert w2t.shape == (H, E) and b1.shape == (H,) and b2.shape == (E,)

    cap = _vmem_capacity_bytes()
    limit = vmem_limit_bytes if vmem_limit_bytes is not None else _default_vmem_limit(cap)
    limit = min(limit, cap)

    E_pad = _round_up(E, 128)
    H_pad_full = _round_up(H, 128)

    # ---- residency decision (nominal tile_m; smaller tiles only shrink use) --
    tm_nominal = _round_up(tile_m, 8) if tile_m is not None else 256
    wt_bytes = 2 * E_pad * H_pad_full * 2          # bf16 W1 + W2
    resident_need = (2 * wt_bytes                  # conservative double-buffer count
                     + 2 * tm_nominal * E_pad * 2  # x tiles (bf16, double-buffered)
                     + 2 * tm_nominal * E_pad * 4  # out tiles (<= f32, double-buffered)
                     + tm_nominal * H_pad_full * 4  # hidden activation (f32)
                     + 2 * (H_pad_full + E_pad) * 4)
    use_resident = (not force_streamed) and resident_need <= int(0.9 * limit)

    def _pad(a, shape, dtype):
        out = jnp.zeros(shape, dtype)  # zero padding -> padded columns contribute 0
        return out.at[tuple(slice(0, s) for s in a.shape)].set(a.astype(dtype))

    b2_p = _pad(b2[None, :], (1, E_pad), jnp.float32)

    if use_resident:
        H_pad = H_pad_full
        th = None
        n_h = 1
        w1_p = _pad(w1t, (E_pad, H_pad), jnp.bfloat16)
        w2_p = _pad(w2t, (H_pad, E_pad), jnp.bfloat16)
        b1_p = _pad(b1[None, :], (1, H_pad), jnp.float32)
    else:
        th = _round_up(tile_h if tile_h is not None else 1024, 128)
        H_pad = _round_up(H, th)
        th = min(th, H_pad)
        n_h = H_pad // th
        w1_full = _pad(w1t, (E_pad, H_pad), jnp.bfloat16)
        # (n_h, E_pad, th): each hidden block of W1^T is one contiguous DMA.
        w1_p = w1_full.reshape(E_pad, n_h, th).transpose(1, 0, 2)
        w2_p = _pad(w2t, (H_pad, E_pad), jnp.bfloat16)
        b1_p = _pad(b1[None, :], (1, H_pad), jnp.float32)

    def f(x):
        assert x.ndim == 2 and x.shape[1] == E, "input must be (size_context, size_embedding)"
        T = x.shape[0]
        odt = jnp.dtype(out_dtype) if out_dtype is not None else jnp.dtype(x.dtype)

        # ---- row tile ----
        if tile_m is not None:
            tm = _round_up(tile_m, 8)
        else:
            tm = min(256 if use_resident else 512, _round_up(T, 8))
            # v7x has 2 TensorCores: prefer >= 2 row steps so the "parallel"
            # axis can shard across both cores for short sequences.
            if _round_up(T, tm) // tm < 2 and tm >= 16:
                half = _round_up((tm + 1) // 2, 8)
                if _round_up(T, half) // half >= 2:
                    tm = half
        T_pad = _round_up(T, tm)
        n_m = T_pad // tm

        # ---- pad / cast x only when actually required ----
        xb = x.astype(jnp.bfloat16)
        if (T_pad, E_pad) != (T, E):
            xb = jnp.zeros((T_pad, E_pad), jnp.bfloat16).at[:T, :E].set(xb)

        flops = 2 * 2 * T_pad * E_pad * H_pad
        out_bytes = T_pad * E_pad * odt.itemsize
        params = pltpu.CompilerParams(
            dimension_semantics=("parallel",) if use_resident else ("parallel", "arbitrary"),
            vmem_limit_bytes=limit,
        )

        if use_resident:
            cost = pl.CostEstimate(
                flops=flops, transcendentals=0,
                bytes_accessed=(xb.size * 2 + w1_p.size * 2 + w2_p.size * 2
                                + b1_p.size * 4 + b2_p.size * 4 + out_bytes))
            out_padded = pl.pallas_call(
                _ffn_resident_kernel,
                out_shape=jax.ShapeDtypeStruct((T_pad, E_pad), odt),
                grid_spec=pltpu.PrefetchScalarGridSpec(
                    num_scalar_prefetch=0,
                    grid=(n_m,),
                    in_specs=[
                        pl.BlockSpec((tm, E_pad), lambda i: (i, 0)),       # x row tile
                        pl.BlockSpec((E_pad, H_pad), lambda i: (0, 0)),    # W1^T resident
                        pl.BlockSpec((1, H_pad), lambda i: (0, 0)),        # b1 resident
                        pl.BlockSpec((H_pad, E_pad), lambda i: (0, 0)),    # W2^T resident
                        pl.BlockSpec((1, E_pad), lambda i: (0, 0)),        # b2 resident
                    ],
                    out_specs=pl.BlockSpec((tm, E_pad), lambda i: (i, 0)),
                ),
                compiler_params=params,
                cost_estimate=cost,
            )(xb, w1_p, b1_p, w2_p, b2_p)
        else:
            needs_acc = odt != jnp.dtype(jnp.float32)
            wt_pipe = pl.Buffered(3) if n_h >= 3 else None
            cost = pl.CostEstimate(
                flops=flops, transcendentals=0,
                bytes_accessed=(xb.size * 2
                                + n_m * (w1_p.size * 2 + w2_p.size * 2
                                         + b1_p.size * 4 + b2_p.size * 4)
                                + out_bytes))
            scratch = (pltpu.VMEM((tm, E_pad), jnp.float32),) if needs_acc else ()
            out_padded = pl.pallas_call(
                _ffn_streamed_kernel,
                out_shape=jax.ShapeDtypeStruct((T_pad, E_pad), odt),
                grid_spec=pltpu.PrefetchScalarGridSpec(
                    num_scalar_prefetch=0,
                    grid=(n_m, n_h),
                    in_specs=[
                        pl.BlockSpec((tm, E_pad), lambda i, h: (i, 0)),      # x row tile
                        pl.BlockSpec((1, E_pad, th), lambda i, h: (h, 0, 0), # W1^T block (contig)
                                     pipeline_mode=wt_pipe),
                        pl.BlockSpec((1, th), lambda i, h: (0, h)),          # b1 slice
                        pl.BlockSpec((th, E_pad), lambda i, h: (h, 0),       # W2^T block
                                     pipeline_mode=wt_pipe),
                        pl.BlockSpec((1, E_pad), lambda i, h: (0, 0)),       # b2
                    ],
                    out_specs=pl.BlockSpec((tm, E_pad), lambda i, h: (i, 0)),
                    scratch_shapes=scratch,
                ),
                compiler_params=params,
                cost_estimate=cost,
            )(xb, w1_p, b1_p, w2_p, b2_p)

        return out_padded[:T, :E]

    f.mode = "resident" if use_resident else "streamed"
    return f


# ----------------------------------------------------------------------------
# References
# ----------------------------------------------------------------------------
def reference_ffn_mixed(x, w1t, b1, w2t, b2):
    """Same mixed precision as the kernel: bf16 MXU inputs, f32 accumulate."""
    h = jnp.dot(x.astype(jnp.bfloat16), w1t.astype(jnp.bfloat16),
                preferred_element_type=jnp.float32) + b1
    h = jnp.maximum(h, 0.0)
    y = jnp.dot(h.astype(jnp.bfloat16), w2t.astype(jnp.bfloat16),
                preferred_element_type=jnp.float32) + b2
    return y.astype(jnp.float32)


def reference_ffn_f32(x, w1t, b1, w2t, b2):
    h = jnp.maximum(x @ w1t + b1, 0.0)
    return h @ w2t + b2


# ----------------------------------------------------------------------------
if __name__ == "__main__":
    key = jax.random.PRNGKey(0)

    def init_params(k, E, H):
        k1, k2, k3, k4 = jax.random.split(k, 4)
        bound1 = 1.0 / (E ** 0.5)
        bound2 = 1.0 / (H ** 0.5)
        w1t = jax.random.uniform(k1, (E, H), jnp.float32, -bound1, bound1)   # = W1.T
        b1 = jax.random.uniform(k2, (H,), jnp.float32, -bound1, bound1)
        w2t = jax.random.uniform(k3, (H, E), jnp.float32, -bound2, bound2)   # = W2.T
        b2 = jax.random.uniform(k4, (E,), jnp.float32, -bound2, bound2)
        return w1t, b1, w2t, b2

    # --- Test 1: resident-weights path at module-scale small shapes ----------
    T, E = 8, 32           # (size_context, size_embedding)
    H = 4 * E              # hidden hard-coded to 4x per the paper
    kx, kp = jax.random.split(key)
    x = jax.random.normal(kx, (T, E), dtype=jnp.float32)
    w1t, b1, w2t, b2 = init_params(kp, E, H)

    ffn = make_feed_forward(w1t, b1, w2t, b2)
    assert ffn.mode == "resident"
    out = jax.block_until_ready(ffn(x))
    assert out.shape == (T, E)
    ref_mixed = reference_ffn_mixed(x, w1t, b1, w2t, b2)
    ref_f32 = reference_ffn_f32(x, w1t, b1, w2t, b2)
    assert jnp.allclose(out, ref_mixed, atol=1e-2, rtol=1e-2), "resident vs mixed ref"
    assert jnp.allclose(out, ref_f32, atol=5e-2, rtol=5e-2), "resident vs f32 ref"

    # --- Test 2: bf16 output (halves writeback for bf16 consumers) -----------
    ffn_bf16 = make_feed_forward(w1t, b1, w2t, b2, out_dtype=jnp.bfloat16)
    out_bf16 = jax.block_until_ready(ffn_bf16(x))
    assert out_bf16.dtype == jnp.bfloat16
    assert jnp.allclose(out_bf16.astype(jnp.float32), ref_mixed, atol=2e-2, rtol=5e-2), \
        "bf16 output vs mixed ref"

    # --- Test 3: forced streamed fallback (hidden tiling, contiguous W1 blocks,
    #             Buffered(3), accumulate-into-output) ------------------------
    T2, E2 = 16, 128
    H2 = 4 * E2
    kx2, kp2 = jax.random.split(jax.random.fold_in(key, 1))
    x2 = jax.random.normal(kx2, (T2, E2), dtype=jnp.float32)
    w1t2, b12, w2t2, b22 = init_params(kp2, E2, H2)
    ffn_s = make_feed_forward(w1t2, b12, w2t2, b22,
                              force_streamed=True, tile_m=8, tile_h=128)
    assert ffn_s.mode == "streamed"
    out2 = jax.block_until_ready(ffn_s(x2))
    assert out2.shape == (T2, E2)
    ref2_mixed = reference_ffn_mixed(x2, w1t2, b12, w2t2, b22)
    ref2_f32 = reference_ffn_f32(x2, w1t2, b12, w2t2, b22)
    assert jnp.allclose(out2, ref2_mixed, atol=1e-2, rtol=1e-2), "streamed vs mixed ref"
    assert jnp.allclose(out2, ref2_f32, atol=5e-2, rtol=5e-2), "streamed vs f32 ref"

    print("KERNEL_OK")
</pallas_src>

<mosaic_0001>
module attributes {stable_mosaic.version = 11 : i64} {
  func.func @_ffn_resident_kernel(%arg0: i32, %arg1: memref<8x128xbf16, #tpu.memory_space<vmem>>, %arg2: memref<128x128xbf16, #tpu.memory_space<vmem>>, %arg3: memref<1x128xf32, #tpu.memory_space<vmem>>, %arg4: memref<128x128xbf16, #tpu.memory_space<vmem>>, %arg5: memref<1x128xf32, #tpu.memory_space<vmem>>, %arg6: memref<8x128xf32, #tpu.memory_space<vmem>>) attributes {dimension_semantics = [#tpu.dimension_semantics<parallel>], iteration_bounds = array<i64: 1>, scalar_prefetch = 0 : i64, scratch_operands = 0 : i64, tpu.core_type = #tpu.core_type<tc>, window_params = [{transform_indices = @transform_0, window_bounds = array<i64: 8, 128>}, {pipeline_mode = #tpu.pipeline_mode<synchronous>, transform_indices = @transform_1, window_bounds = array<i64: 128, 128>}, {pipeline_mode = #tpu.pipeline_mode<synchronous>, transform_indices = @transform_2, window_bounds = array<i64: 1, 128>}, {pipeline_mode = #tpu.pipeline_mode<synchronous>, transform_indices = @transform_3, window_bounds = array<i64: 128, 128>}, {pipeline_mode = #tpu.pipeline_mode<synchronous>, transform_indices = @transform_4, window_bounds = array<i64: 1, 128>}, {transform_indices = @transform_5, window_bounds = array<i64: 8, 128>}]} {
    %c0 = arith.constant 0 : index
    %c0_0 = arith.constant 0 : index
    %0 = vector.load %arg1[%c0, %c0_0] : memref<8x128xbf16, #tpu.memory_space<vmem>>, vector<8x128xbf16>
    %c0_1 = arith.constant 0 : index
    %c0_2 = arith.constant 0 : index
    %1 = vector.load %arg2[%c0_1, %c0_2] : memref<128x128xbf16, #tpu.memory_space<vmem>>, vector<128x128xbf16>
    %cst = arith.constant dense<0.000000e+00> : vector<8x128xf32>
    %2 = tpu.matmul %0, %1, %cst {dimension_numbers = #tpu.dot_dimension_numbers<[1], [0], [0], [1], [0, 0, 1, 1], [], []>} : vector<8x128xbf16>, vector<128x128xbf16>, vector<8x128xf32> -> vector<8x128xf32>
    %c0_3 = arith.constant 0 : index
    %c0_4 = arith.constant 0 : index
    %3 = vector.load %arg3[%c0_3, %c0_4] : memref<1x128xf32, #tpu.memory_space<vmem>>, vector<1x128xf32>
    %4 = vector.broadcast %3 : vector<1x128xf32> to vector<8x128xf32>
    %5 = arith.addf %2, %4 : vector<8x128xf32>
    %cst_5 = arith.constant 0.000000e+00 : f32
    %6 = vector.broadcast %cst_5 : f32 to vector<8x128xf32>
    %7 = arith.maximumf %5, %6 : vector<8x128xf32>
    %8 = arith.truncf %7 : vector<8x128xf32> to vector<8x128xbf16>
    %c0_6 = arith.constant 0 : index
    %c0_7 = arith.constant 0 : index
    %9 = vector.load %arg4[%c0_6, %c0_7] : memref<128x128xbf16, #tpu.memory_space<vmem>>, vector<128x128xbf16>
    %cst_8 = arith.constant dense<0.000000e+00> : vector<8x128xf32>
    %10 = tpu.matmul %8, %9, %cst_8 {dimension_numbers = #tpu.dot_dimension_numbers<[1], [0], [0], [1], [0, 0, 1, 1], [], []>} : vector<8x128xbf16>, vector<128x128xbf16>, vector<8x128xf32> -> vector<8x128xf32>
    %c0_9 = arith.constant 0 : index
    %c0_10 = arith.constant 0 : index
    %11 = vector.load %arg5[%c0_9, %c0_10] : memref<1x128xf32, #tpu.memory_space<vmem>>, vector<1x128xf32>
    %12 = vector.broadcast %11 : vector<1x128xf32> to vector<8x128xf32>
    %13 = arith.addf %10, %12 : vector<8x128xf32>
    %c0_11 = arith.constant 0 : index
    %c0_12 = arith.constant 0 : index
    %14 = vector.load %arg6[%c0_11, %c0_12] : memref<8x128xf32, #tpu.memory_space<vmem>>, vector<8x128xf32>
    tpu.vector_store %arg6[%c0_11, %c0_12], %13 {strides = array<i32>} : memref<8x128xf32, #tpu.memory_space<vmem>>, vector<8x128xf32>,
    return
  }
  func.func @transform_0(%arg0: i32) -> (i32, i32) {
    %c0_i32 = arith.constant 0 : i32
    %c0_i32_0 = arith.constant 0 : i32
    return %arg0, %c0_i32 : i32, i32
  }
  func.func @transform_1(%arg0: i32) -> (i32, i32) {
    %c0_i32 = arith.constant 0 : i32
    %c0_i32_0 = arith.constant 0 : i32
    %c0_i32_1 = arith.constant 0 : i32
    return %c0_i32, %c0_i32_0 : i32, i32
  }
  func.func @transform_2(%arg0: i32) -> (i32, i32) {
    %c0_i32 = arith.constant 0 : i32
    %c0_i32_0 = arith.constant 0 : i32
    %c0_i32_1 = arith.constant 0 : i32
    return %c0_i32, %c0_i32_0 : i32, i32
  }
  func.func @transform_3(%arg0: i32) -> (i32, i32) {
    %c0_i32 = arith.constant 0 : i32
    %c0_i32_0 = arith.constant 0 : i32
    %c0_i32_1 = arith.constant 0 : i32
    return %c0_i32, %c0_i32_0 : i32, i32
  }
  func.func @transform_4(%arg0: i32) -> (i32, i32) {
    %c0_i32 = arith.constant 0 : i32
    %c0_i32_0 = arith.constant 0 : i32
    %c0_i32_1 = arith.constant 0 : i32
    return %c0_i32, %c0_i32_0 : i32, i32
  }
  func.func @transform_5(%arg0: i32) -> (i32, i32) {
    %c0_i32 = arith.constant 0 : i32
    %c0_i32_0 = arith.constant 0 : i32
    return %arg0, %c0_i32 : i32, i32
  }
}

</mosaic_0001>

<bundles_post_ra>
// kernel: tpu_custom_call.1
= control target key start
LH: loop header
LB: loop body
LE: loop exit
PB: predicated region body
PF: predicated region fallthrough
CT: control target
= control target key end

     0   :  { %10 = vsyncpa [#allocation3], 0  ;;  %s595_s0 = inlined_call_operand.hbm [shape: bf16[8,128], index: 0, kind: input, shape index: {}]   ;;  %s596_s1 = inlined_call_operand.hbm [shape: bf16[128,128], index: 1, kind: input, shape index: {}]   ;;  %s597_s2 = inlined_call_operand.vmem [shape: f32[1,128], index: 2, kind: input, shape index: {}]   ;;  %s598_s3 = inlined_call_operand.hbm [shape: bf16[128,128], index: 3, kind: input, shape index: {}]   ;;  %s599_s4 = inlined_call_operand.vmem [shape: f32[1,128], index: 4, kind: input, shape index: {}]   ;;  %s600_s5 = inlined_call_operand.hbm [shape: f32[8,128], index: 5, kind: output, shape index: {}]  }
   0x1   :  { %11 = vsyncpa [#allocation6], 0 }
   0x2   :  { %12 = vsyncpa [#allocation4], 0  ;;  %s497_s18 = smov [#allocation5]   ;;  %s403_s22 = scalar_lea.hbm %s596_s1, 1024 }
   0x3   :  { %s28_s19 = sshll.u32 %s497_s18, 4  ;;  %p404_p0 = scmp.ne.s32.totalorder %s596_s1, %s403_s22  ;;  %s29_s19 = int_to_ptr.vmem [resolvable:$true] %s28_s19 }
   0x4   :  { %p407_p1 = scmp.lt.u32.totalorder %s403_s22, %s596_s1 }
   0x6   :  { %p409_p2 = pnand %p407_p1, %p404_p0 }
   0x8   :  { %412 = shalt.err (!%p409_p2)
}
   0x9   :  { %s413_s27 = scalar_lea.vmem %s29_s19, 1024  ;;  %p418_p4 = scmp.lt.s32.totalorder %s29_s19, %s29_s19 }
   0xa   :  { %p414_p3 = scmp.ne.s32.totalorder %s29_s19, %s413_s27  ;;  %p419_p5 = scmp.lt.s32.totalorder %s413_s27, %s413_s27 }
   0xc   :  { %p420_p6 = por %p419_p5, %p418_p4 }
   0xe   :  { %p421_p7 = pnand %p420_p6, %p414_p3 }
  0x10   :  { %424 = shalt.err (!%p421_p7)
}
  0x11   :  { %s498_s28 = smov 64   ;;  %s499_s29 = smov 4  }
  0x12   :  { %34 = dma.hbm_to_vmem [thread:$0]  %s596_s1, 1024, %s29_s19, [#allocation6], %s498_s28, %s498_s28, %s499_s29  }
  0x13   :  { %s500_s7 = smov [#allocation2]   ;;  %s501_s9 = smov [#allocation7]  }
  0x14   :  { %s19_s8 = sshll.u32 %s500_s7, 4  ;;  %s42_s10 = sshll.u32 %s501_s9, 4  ;;  %s20_s8 = int_to_ptr.vmem [resolvable:$true] %s19_s8  ;;  %s43_s10 = int_to_ptr.vmem [resolvable:$true] %s42_s10 }
  0x15   :  { %s425_s13 = scalar_lea.hbm %s595_s0, 64 }
  0x16   :  { %p426_p8 = scmp.ne.s32.totalorder %s595_s0, %s425_s13  ;;  %p429_p9 = scmp.lt.u32.totalorder %s425_s13, %s595_s0 }
  0x18   :  { %p431_p10 = pnand %p429_p9, %p426_p8 }
  0x1a   :  { %434 = shalt.err (!%p431_p10)
}
  0x1b   :  { %s435_s1 = scalar_lea.vmem %s20_s8, 64  ;;  %p440_p12 = scmp.lt.s32.totalorder %s20_s8, %s20_s8 }
  0x1c   :  { %p436_p11 = scmp.ne.s32.totalorder %s20_s8, %s435_s1  ;;  %p441_p13 = scmp.lt.s32.totalorder %s435_s1, %s435_s1 }
  0x1e   :  { %p442_p0 = por %p441_p13, %p440_p12 }
  0x20   :  { %p443_p1 = pnand %p442_p0, %p436_p11 }
  0x22   :  { %446 = shalt.err (!%p443_p1)
}
  0x23   :  { %22 = dma.hbm_to_vmem [thread:$0]  %s595_s0, 64, %s20_s8, [#allocation3]  }
  0x24   :  { %s447_s22 = scalar_lea.hbm %s598_s3, 1024 }
  0x25   :  { %p448_p2 = scmp.ne.s32.totalorder %s598_s3, %s447_s22  ;;  %p451_p3 = scmp.lt.u32.totalorder %s447_s22, %s598_s3 }
  0x27   :  { %p453_p4 = pnand %p451_p3, %p448_p2 }
  0x29   :  { %456 = shalt.err (!%p453_p4)
}
  0x2a   :  { %s457_s27 = scalar_lea.vmem %s43_s10, 1024  ;;  %p462_p6 = scmp.lt.s32.totalorder %s43_s10, %s43_s10 }
  0x2b   :  { %p458_p5 = scmp.ne.s32.totalorder %s43_s10, %s457_s27  ;;  %p463_p7 = scmp.lt.s32.totalorder %s457_s27, %s457_s27 }
  0x2d   :  { %p464_p8 = por %p463_p7, %p462_p6 }
  0x2f   :  { %p465_p9 = pnand %p464_p8, %p458_p5 }
  0x31   :  { %468 = shalt.err (!%p465_p9)
}
  0x32   :  { %48 = dma.hbm_to_vmem [thread:$0]  %s598_s3, 1024, %s43_s10, [#allocation6], %s498_s28, %s498_s28, %s499_s29  }
  0x33   :  { %491 = dma.done.wait [#allocation3], 64  }
  0x34   :  { %492 = vsyncadd [#allocation3], 4294967232 }
  0x35   :  { %493 = dma.done.wait [#allocation6], 2048  }
  0x36   :  { %494 = vsyncadd [#allocation6], 4294965248  ;;  %v502_v0 = vmov 0.0   ;;  %vm503_vm0 = vmmov 0   ;;  %v387_v1 = vld [vmem:[#allocation5] sm:$0xff]   ;;  %v388_v2 = vld [vmem:[#allocation5 + $0x8] sm:$0xff]  }
  0x37   :  { %339 = vmatprep.subr.bf16.mxu0 %v502_v0  ;;  %355 = vmatprep.mubr.msk.bf16.mxu0 %vm503_vm0, %v502_v0  ;;  %v389_v3 = vld [vmem:[#allocation5 + $0x10] sm:$0xff]   ;;  %v395_v4 = vld [vmem:[#allocation7] sm:$0xff]   ;;  %v390_v5 = vld [vmem:[#allocation5 + $0x18] sm:$0xff]   ;;  %s504_s7 = smov [#allocation8]  }
  0x38   :  { %359 = vmatprep.subr.bf16.mxu1 %v502_v0  ;;  %375 = vmatprep.mubr.msk.bf16.mxu1 %vm503_vm0, %v502_v0  ;;  %v396_v6 = vld [vmem:[#allocation7 + $0x8] sm:$0xff]   ;;  %v391_v7 = vld [vmem:[#allocation5 + $0x20] sm:$0xff]   ;;  %v397_v8 = vld [vmem:[#allocation7 + $0x10] sm:$0xff]   ;;  %s293_s8 = sshll.u32 %s504_s7, 4  ;;  %s294_s8 = int_to_ptr.vmem [resolvable:$true] %s293_s8 }
  0x39   :  { %340 = vmatpush3.bf16.msra.mxu0 %v387_v1  ;;  %360 = vmatpush3.bf16.msra.mxu1 %v395_v4  ;;  %v392_v9 = vld [vmem:[#allocation5 + $0x28] sm:$0xff]   ;;  %v398_v10 = vld [vmem:[#allocation7 + $0x18] sm:$0xff]   ;;  %v393_v11 = vld [vmem:[#allocation5 + $0x30] sm:$0xff]   ;;  %p474_p11 = scmp.lt.s32.totalorder %s294_s8, %s294_s8 }
  0x3a   :  { %341 = vmatprep.subr.bf16.mxu0 %v502_v0  ;;  %361 = vmatprep.subr.bf16.mxu1 %v502_v0  ;;  %v399_v12 = vld [vmem:[#allocation7 + $0x20] sm:$0xff]   ;;  %v394_v13 = vld [vmem:[#allocation5 + $0x38] sm:$0xff]   ;;  %v400_v14 = vld [vmem:[#allocation7 + $0x28] sm:$0xff]  }
  0x3b   :  { %v61_v15 = vld [vmem:[#allocation2] sm:$0xf]  ;;  %v401_v16 = vld [vmem:[#allocation7 + $0x30] sm:$0xff]  }
  0x3c   :  { %v402_v17 = vld [vmem:[#allocation7 + $0x38] sm:$0xff]  }
  0x3d   :  { %342 = vmatpush3.bf16.msra.mxu0 %v388_v2  ;;  %362 = vmatpush3.bf16.msra.mxu1 %v396_v6  ;;  %v303_v18 = vld [vmem:[%s597_s2] ss:$0 sm:$0xff]  ;;  %s469_s2 = scalar_lea.vmem %s294_s8, 128 }
  0x3e   :  { %343 = vmatprep.subr.bf16.mxu0 %v502_v0  ;;  %363 = vmatprep.subr.bf16.mxu1 %v502_v0  ;;  %v312_v26 = vld [vmem:[%s599_s4] ss:$0 sm:$0xff]  ;;  %p470_p10 = scmp.ne.s32.totalorder %s294_s8, %s469_s2  ;;  %p475_p12 = scmp.lt.s32.totalorder %s469_s2, %s469_s2 }
  0x40   :  { %p476_p13 = por %p475_p12, %p474_p11 }
  0x41   :  { %344 = vmatpush3.bf16.msra.mxu0 %v389_v3  ;;  %364 = vmatpush3.bf16.msra.mxu1 %v397_v8 }
  0x42   :  { %345 = vmatprep.subr.bf16.mxu0 %v502_v0  ;;  %365 = vmatprep.subr.bf16.mxu1 %v502_v0  ;;  %p477_p0 = pnand %p476_p13, %p470_p10 }
  0x45   :  { %346 = vmatpush3.bf16.msra.mxu0 %v390_v5  ;;  %366 = vmatpush3.bf16.msra.mxu1 %v398_v10 }
  0x46   :  { %347 = vmatprep.subr.bf16.mxu0 %v502_v0  ;;  %367 = vmatprep.subr.bf16.mxu1 %v502_v0 }
  0x49   :  { %348 = vmatpush3.bf16.msra.mxu0 %v391_v7  ;;  %368 = vmatpush3.bf16.msra.mxu1 %v399_v12 }
  0x4a   :  { %349 = vmatprep.subr.bf16.mxu0 %v502_v0  ;;  %369 = vmatprep.subr.bf16.mxu1 %v502_v0 }
  0x4d   :  { %350 = vmatpush3.bf16.msra.mxu0 %v392_v9  ;;  %370 = vmatpush3.bf16.msra.mxu1 %v400_v14 }
  0x4e   :  { %351 = vmatprep.subr.bf16.mxu0 %v502_v0  ;;  %371 = vmatprep.subr.bf16.mxu1 %v502_v0 }
  0x51   :  { %352 = vmatpush3.bf16.msra.mxu0 %v393_v11  ;;  %372 = vmatpush3.bf16.msra.mxu1 %v401_v16 }
  0x52   :  { %353 = vmatprep.subr.bf16.mxu0 %v502_v0  ;;  %373 = vmatprep.subr.bf16.mxu1 %v502_v0 }
  0x55   :  { %354 = vmatpush3.bf16.msra.mxu0 %v394_v13  ;;  %374 = vmatpush3.bf16.msra.mxu1 %v402_v17 }
  0x58   :  { %356 = vmatmul.mubr.bf16.vlgmr.msra.gmra.mrb[0].mxu0 %v61_v15 }
 0x12b   :  { %v167_v19 = vpop.f32.mrb[0].mxu0 }
 0x12c   :  { %v168_v20 = vadd.f32 %v303_v18, %v167_v19  ;;  %v357_v21 = vpop.f32.mrb[1].mxu0 }
 0x12d   :  { %v170_v22 = vpop.f32.mrb[2].mxu0 }
 0x12e   :  { %v173_v23 = vmax.f32 %v168_v20, 0.0  ;;  %v358_v24 = vpop.f32.mrb[3].mxu0 }
 0x130   :  { %v174_v25 = vpack.c.bf16 %v173_v23, %v173_v23 }
 0x132   :  { %376 = vmatmul.mubr.bf16.vlgmr.msra.gmra.mrb[0].mxu1 %v174_v25 }
 0x205   :  { %v280_v27 = vpop.f32.mrb[0].mxu1 }
 0x206   :  { %v281_v28 = vadd.f32 %v312_v26, %v280_v27  ;;  %v377_v29 = vpop.f32.mrb[1].mxu1 }
 0x207   :  { %v283_v30 = vpop.f32.mrb[2].mxu1 }
 0x208   :  { %286 = vst [vmem:[#allocation8] sm:$0xff] %v281_v28  ;;  %v378_v31 = vpop.f32.mrb[3].mxu1 }
 0x209   :  { %480 = shalt.err (!%p477_p0)
}
 0x20a   :  { %s481_s4 = scalar_lea.hbm %s600_s5, 128 }
 0x20b   :  { %p482_p1 = scmp.ne.s32.totalorder %s600_s5, %s481_s4  ;;  %p485_p2 = scmp.lt.u32.totalorder %s481_s4, %s600_s5 }
 0x20d   :  { %p487_p3 = pnand %p485_p2, %p482_p1 }
 0x20f   :  { %490 = shalt.err (!%p487_p3)
}
 0x210   :  { %296 = dma.vmem_to_hbm [thread:$0]  %s294_s8, 128, %s600_s5, [#allocation4]  }
 0x211   :  { %495 = dma.done.wait [#allocation4], 128  }
 0x212   :  { %496 = vsyncadd [#allocation4], 4294967168 }
 0x213   :  { %300 = vsyncpa [#allocation3], 1 }
 0x214   :  { %301 = vsyncpa [#allocation6], 1 }
 0x215   :  { %302 = vsyncpa [#allocation4], 1 }

</bundles_post_ra>
